<compile_context>
chip_gen: v6e
topology: v6e:2x2x1
jax: 0.10.0
libtpu: 0.0.40
codegen_flags: <defaults>
</compile_context>

<pallas_src>
import functools
import math

import jax
import jax.numpy as jnp
from jax.experimental import pallas as pl
from jax.experimental.pallas import tpu as pltpu


def _round_up(x, m):
    return ((x + m - 1) // m) * m


def _pick_tile(s, candidates):
    for c in candidates:
        if s % c == 0:
            return c
    return s


def flash_attention_head_kernel(hq_ref, hkv_ref, wq_ref, wkv_ref, bq_ref,
                                bkv_ref, out_ref,
                                q_scr, m_scr, l_scr, acc_scr,
                                *, head_pad, use_bf16):
    """One grid step: (batch block b, q tile i, kv tile j).

    hq_ref:  (bb, tq, E)          activations for the q tile
    hkv_ref: (bb, tk, E)          activations for the kv tile
    wq_ref:  (E, head_pad)        Wq * 1/sqrt(H), zero-padded columns
    wkv_ref: (E, 2*head_pad)      [Wk | Wv], zero-padded columns
    bq_ref:  (1, head_pad)        bq * 1/sqrt(H) (f32)
    bkv_ref: (1, 2*head_pad)      [bk | bv] (f32)
    out_ref: (bb, tq, head_pad)   lane-dense output block (resident across j)
    q_scr:   (bb, tq, head_pad)   cached projected Q (mm dtype)
    m_scr:   (bb, tq, 1) f32      running max
    l_scr:   (bb, tq, 1) f32      running sum of exp
    acc_scr: (bb, tq, head_pad)   unnormalized output accumulator (f32)
    """
    j = pl.program_id(2)
    n_kv = pl.num_programs(2)
    bb, tq, E = hq_ref.shape
    _, tk, _ = hkv_ref.shape
    mm_dtype = jnp.bfloat16 if use_bf16 else jnp.float32

    @pl.when(j == 0)
    def _init():
        m_scr[...] = jnp.full_like(m_scr, -jnp.inf)
        l_scr[...] = jnp.zeros_like(l_scr)
        acc_scr[...] = jnp.zeros_like(acc_scr)
        # Q projection for this (batch, q-tile) block; the 1/sqrt(H) attention
        # scale is already folded into wq/bq in the wrapper.
        hq2 = hq_ref[...].reshape(bb * tq, E)
        q = jnp.dot(hq2, wq_ref[...], preferred_element_type=jnp.float32)
        q = q + bq_ref[...]                                  # f32 bias add (VPU)
        q_scr[...] = q.reshape(bb, tq, head_pad).astype(q_scr.dtype)

    # Fused K/V projection for this kv tile: one (bb*tk, E) @ (E, 2*H_pad) pass.
    hk2 = hkv_ref[...].reshape(bb * tk, E)
    kv = jnp.dot(hk2, wkv_ref[...], preferred_element_type=jnp.float32)
    kv = kv + bkv_ref[...]
    kv = kv.reshape(bb, tk, 2 * head_pad)
    k = kv[..., :head_pad].astype(mm_dtype)       # slices at 128-lane multiples
    v = kv[..., head_pad:].astype(mm_dtype)

    # scores = (Q / sqrt(H)) @ K^T, batched; contraction expressed directly
    # (no explicit transpose).  Padded head columns are zero -> no effect.
    s = jnp.einsum('bqd,bkd->bqk', q_scr[...].astype(mm_dtype), k,
                   preferred_element_type=jnp.float32)        # (bb, tq, tk)

    # Online softmax: carry UNNORMALIZED probabilities into PV; normalize the
    # (tq, head_pad) accumulator once at finalize (flash epilogue).
    m_prev = m_scr[...]
    m_new = jnp.maximum(m_prev, jnp.max(s, axis=-1, keepdims=True))
    alpha = jnp.exp(m_prev - m_new)
    p = jnp.exp(s - m_new)
    l_scr[...] = alpha * l_scr[...] + jnp.sum(p, axis=-1, keepdims=True)
    acc_scr[...] = alpha * acc_scr[...] + jnp.einsum(
        'bqk,bkd->bqd', p.astype(mm_dtype), v,
        preferred_element_type=jnp.float32)
    m_scr[...] = m_new

    @pl.when(j == n_kv - 1)
    def _finalize():
        # approx reciprocal goes to the EUP slot; ~2^-12 rel error.  Use the
        # exact divide here if production numerics require it.
        inv_l = pl.reciprocal(l_scr[...], approx=True)
        out_ref[...] = (acc_scr[...] * inv_l).astype(out_ref.dtype)


def attention_head(hidden_state, wq, bq, wk, bk, wv, bv, *,
                   batch_block=1, q_block=None, kv_block=None, use_bf16=True):
    """hidden_state: [B, S, E]; wq/wk/wv: [E, H]; bq/bk/bv: [1, H] -> [B, S, H]."""
    B, S, E = hidden_state.shape
    H = wq.shape[1]

    assert S % 8 == 0, "S must be a multiple of 8 (sublane tiling); pad outside"
    assert B % batch_block == 0, "batch_block must divide B"

    # Fold the 1/sqrt(H) attention scale into the Q projection (exact up to f32
    # rounding) so there is no per-element score scaling in the kernel.
    scale = 1.0 / math.sqrt(H)
    wq = wq * scale
    bq = bq * scale

    # Pad the head dim to a multiple of 128 so in-kernel slices and the output
    # store are lane-dense (unmasked vst).  Padded columns are zero, so they do
    # not change scores or output; padding is stripped after the call.
    H_pad = _round_up(H, 128)
    pad = H_pad - H
    if pad:
        wq, wk, wv = [jnp.pad(w, ((0, 0), (0, pad))) for w in (wq, wk, wv)]
        bq, bk, bv = [jnp.pad(b, ((0, 0), (0, pad))) for b in (bq, bk, bv)]

    # Fuse K/V projections into one weight / one bias operand.
    w_kv = jnp.concatenate([wk, wv], axis=1)                      # [E, 2*H_pad]
    b_kv = jnp.concatenate([bk, bv], axis=1).astype(jnp.float32)  # [1, 2*H_pad]
    bq = bq.astype(jnp.float32)

    mm_dtype = jnp.bfloat16 if use_bf16 else jnp.float32
    wq = wq.astype(mm_dtype)
    w_kv = w_kv.astype(mm_dtype)
    # Cast activations in the wrapper: halves the activation HBM->VMEM DMA
    # bytes instead of casting after the data is already in VMEM.
    h = hidden_state.astype(mm_dtype) if use_bf16 else hidden_state

    # Tile sizes: largest divisor of S from the candidate lists (v7x-friendly
    # defaults; override via q_block/kv_block for other generations).
    bb = batch_block
    tq = q_block if q_block is not None else _pick_tile(S, (256, 128, 64, 32, 16, 8))
    tk = kv_block if kv_block is not None else _pick_tile(S, (512, 256, 128, 64, 32, 16, 8))
    assert S % tq == 0 and S % tk == 0
    n_q, n_kv = S // tq, S // tk

    out_dtype = hidden_state.dtype
    act_bytes = jnp.dtype(mm_dtype).itemsize
    out_bytes = jnp.dtype(out_dtype).itemsize
    E_lanes = _round_up(E, 128)

    # Explicit VMEM budget from the actual block/scratch sizes (double-buffered
    # activations/output, single-buffered weights) so the compiler does not
    # fall back to the default scoped limit; capped below v7x's 64 MiB.
    est = (2 * bb * tq * E_lanes * act_bytes            # hq blocks (x2 buffers)
           + 2 * bb * tk * E_lanes * act_bytes          # hkv blocks
           + E * H_pad * act_bytes                      # wq  (single buffer)
           + E * 2 * H_pad * act_bytes                  # wkv (single buffer)
           + 3 * H_pad * 4                              # biases
           + 2 * bb * tq * H_pad * out_bytes            # out blocks
           + bb * tq * H_pad * act_bytes                # q scratch
           + 2 * bb * tq * 128 * 4                      # m, l scratch (lane pad)
           + bb * tq * H_pad * 4)                       # acc scratch
    vmem_limit = int(min(max(2 * est, 32 << 20), 56 << 20))

    grid = (B // bb, n_q, n_kv)
    kernel = functools.partial(flash_attention_head_kernel,
                               head_pad=H_pad, use_bf16=use_bf16)

    out = pl.pallas_call(
        kernel,
        out_shape=jax.ShapeDtypeStruct((B, S, H_pad), out_dtype),
        grid_spec=pltpu.PrefetchScalarGridSpec(
            num_scalar_prefetch=0,
            grid=grid,
            in_specs=[
                # activations for the q tile (constant across the kv axis)
                pl.BlockSpec((bb, tq, E), lambda b, i, j: (b, i, 0)),
                # activations for the kv tile
                pl.BlockSpec((bb, tk, E), lambda b, i, j: (b, j, 0)),
                # constant weights / biases: single-buffered
                pl.BlockSpec((E, H_pad), lambda b, i, j: (0, 0),
                             pipeline_mode=pl.Buffered(1)),
                pl.BlockSpec((E, 2 * H_pad), lambda b, i, j: (0, 0),
                             pipeline_mode=pl.Buffered(1)),
                pl.BlockSpec((1, H_pad), lambda b, i, j: (0, 0),
                             pipeline_mode=pl.Buffered(1)),
                pl.BlockSpec((1, 2 * H_pad), lambda b, i, j: (0, 0),
                             pipeline_mode=pl.Buffered(1)),
            ],
            out_specs=pl.BlockSpec((bb, tq, H_pad), lambda b, i, j: (b, i, 0)),
            scratch_shapes=[
                pltpu.VMEM((bb, tq, H_pad), mm_dtype),     # cached projected Q
                pltpu.VMEM((bb, tq, 1), jnp.float32),      # running max m
                pltpu.VMEM((bb, tq, 1), jnp.float32),      # running sum l
                pltpu.VMEM((bb, tq, H_pad), jnp.float32),  # output accumulator
            ],
        ),
        compiler_params=pltpu.CompilerParams(
            dimension_semantics=("parallel", "parallel", "arbitrary"),
            vmem_limit_bytes=vmem_limit),
    )(h, h, wq, w_kv, bq, b_kv)

    # Strip lane padding outside the kernel (cheap XLA slice).
    return out[..., :H]


def reference(hidden_state, wq, bq, wk, bk, wv, bv):
    q = hidden_state @ wq + bq
    k = hidden_state @ wk + bk
    v = hidden_state @ wv + bv
    scale = 1.0 / math.sqrt(q.shape[-1])
    scores = jnp.einsum('bqd,bkd->bqk', q, k) * scale
    w = jax.nn.softmax(scores, axis=-1)
    return jnp.einsum('bqk,bkd->bqd', w, v)


if __name__ == "__main__":
    # Small shapes consistent with the module: batch=2, seq=8, embed=32, head=16.
    B, S, E, H = 2, 8, 32, 16

    key = jax.random.PRNGKey(0)
    k0, k1, k2, k3, k4, k5, k6 = jax.random.split(key, 7)

    hidden_state = jax.random.normal(k0, (B, S, E), dtype=jnp.float32)

    # Deterministic parameter init (uniform, akin to nn.Linear default scale).
    lim = 1.0 / math.sqrt(E)
    wq = jax.random.uniform(k1, (E, H), jnp.float32, -lim, lim)
    wk = jax.random.uniform(k2, (E, H), jnp.float32, -lim, lim)
    wv = jax.random.uniform(k3, (E, H), jnp.float32, -lim, lim)
    bq = jax.random.uniform(k4, (1, H), jnp.float32, -lim, lim)
    bk = jax.random.uniform(k5, (1, H), jnp.float32, -lim, lim)
    bv = jax.random.uniform(k6, (1, H), jnp.float32, -lim, lim)

    out = attention_head(hidden_state, wq, bq, wk, bk, wv, bv)
    out = jax.block_until_ready(out)

    ref = reference(hidden_state, wq, bq, wk, bk, wv, bv)
    assert out.shape == (B, S, H)
    # Tolerance loosened for bf16 MXU operands, bf16 activation DMA, and the
    # approx EUP reciprocal in the softmax epilogue.
    assert jnp.allclose(out, ref, atol=5e-2, rtol=5e-2), "mismatch vs reference"

    print("KERNEL_OK")
</pallas_src>

<mosaic_0001>
module attributes {stable_mosaic.version = 11 : i64} {
  func.func @flash_attention_head_kernel(%arg0: i32, %arg1: i32, %arg2: i32, %arg3: memref<1x8x32xbf16, #tpu.memory_space<vmem>>, %arg4: memref<1x8x32xbf16, #tpu.memory_space<vmem>>, %arg5: memref<32x128xbf16, #tpu.memory_space<vmem>>, %arg6: memref<32x256xbf16, #tpu.memory_space<vmem>>, %arg7: memref<1x128xf32, #tpu.memory_space<vmem>>, %arg8: memref<1x256xf32, #tpu.memory_space<vmem>>, %arg9: memref<1x8x128xf32, #tpu.memory_space<vmem>>, %arg10: memref<1x8x128xbf16, #tpu.memory_space<vmem>>, %arg11: memref<1x8x1xf32, #tpu.memory_space<vmem>>, %arg12: memref<1x8x1xf32, #tpu.memory_space<vmem>>, %arg13: memref<1x8x128xf32, #tpu.memory_space<vmem>>) attributes {dimension_semantics = [#tpu.dimension_semantics<parallel>, #tpu.dimension_semantics<parallel>, #tpu.dimension_semantics<arbitrary>], iteration_bounds = array<i64: 2, 1, 1>, scalar_prefetch = 0 : i64, scratch_operands = 4 : i64, tpu.core_type = #tpu.core_type<tc>, window_params = [{transform_indices = @transform_0, window_bounds = array<i64: 1, 8, 32>}, {transform_indices = @transform_1, window_bounds = array<i64: 1, 8, 32>}, {pipeline_mode = #tpu.pipeline_mode<synchronous>, transform_indices = @transform_2, window_bounds = array<i64: 32, 128>}, {pipeline_mode = #tpu.pipeline_mode<synchronous>, transform_indices = @transform_3, window_bounds = array<i64: 32, 256>}, {pipeline_mode = #tpu.pipeline_mode<synchronous>, transform_indices = @transform_4, window_bounds = array<i64: 1, 128>}, {pipeline_mode = #tpu.pipeline_mode<synchronous>, transform_indices = @transform_5, window_bounds = array<i64: 1, 256>}, {transform_indices = @transform_6, window_bounds = array<i64: 1, 8, 128>}]} {
    %c0_i32 = arith.constant 0 : i32
    %0 = arith.cmpi eq, %arg2, %c0_i32 : i32
    %1 = arith.extui %0 : i1 to i32
    %c0_i32_0 = arith.constant 0 : i32
    %2 = arith.cmpi ne, %1, %c0_i32_0 : i32
    scf.if %2 {
      %cst_34 = arith.constant 0xFF800000 : f32
      %43 = vector.broadcast %cst_34 : f32 to vector<1x8x1xf32>
      %c0_35 = arith.constant 0 : index
      %c0_36 = arith.constant 0 : index
      %c0_37 = arith.constant 0 : index
      %44 = vector.load %arg11[%c0_35, %c0_36, %c0_37] : memref<1x8x1xf32, #tpu.memory_space<vmem>>, vector<1x8x1xf32>
      tpu.vector_store %arg11[%c0_35, %c0_36, %c0_37], %43 {strides = array<i32>} : memref<1x8x1xf32, #tpu.memory_space<vmem>>, vector<1x8x1xf32>,
      %cst_38 = arith.constant 0.000000e+00 : f32
      %45 = vector.broadcast %cst_38 : f32 to vector<1x8x1xf32>
      %c0_39 = arith.constant 0 : index
      %c0_40 = arith.constant 0 : index
      %c0_41 = arith.constant 0 : index
      %46 = vector.load %arg12[%c0_39, %c0_40, %c0_41] : memref<1x8x1xf32, #tpu.memory_space<vmem>>, vector<1x8x1xf32>
      tpu.vector_store %arg12[%c0_39, %c0_40, %c0_41], %45 {strides = array<i32>} : memref<1x8x1xf32, #tpu.memory_space<vmem>>, vector<1x8x1xf32>,
      %cst_42 = arith.constant 0.000000e+00 : f32
      %47 = vector.broadcast %cst_42 : f32 to vector<1x8x128xf32>
      %c0_43 = arith.constant 0 : index
      %c0_44 = arith.constant 0 : index
      %c0_45 = arith.constant 0 : index
      %48 = vector.load %arg13[%c0_43, %c0_44, %c0_45] : memref<1x8x128xf32, #tpu.memory_space<vmem>>, vector<1x8x128xf32>
      tpu.vector_store %arg13[%c0_43, %c0_44, %c0_45], %47 {strides = array<i32>} : memref<1x8x128xf32, #tpu.memory_space<vmem>>, vector<1x8x128xf32>,
      %c0_46 = arith.constant 0 : index
      %c0_47 = arith.constant 0 : index
      %c0_48 = arith.constant 0 : index
      %49 = vector.load %arg3[%c0_46, %c0_47, %c0_48] : memref<1x8x32xbf16, #tpu.memory_space<vmem>>, vector<1x8x32xbf16>
      %50 = vector.shape_cast %49 : vector<1x8x32xbf16> to vector<8x32xbf16>
      %c0_49 = arith.constant 0 : index
      %c0_50 = arith.constant 0 : index
      %51 = vector.load %arg5[%c0_49, %c0_50] : memref<32x128xbf16, #tpu.memory_space<vmem>>, vector<32x128xbf16>
      %cst_51 = arith.constant dense<0.000000e+00> : vector<8x128xf32>
      %52 = tpu.matmul %50, %51, %cst_51 {dimension_numbers = #tpu.dot_dimension_numbers<[1], [0], [0], [1], [0, 0, 1, 1], [], []>} : vector<8x32xbf16>, vector<32x128xbf16>, vector<8x128xf32> -> vector<8x128xf32>
      %c0_52 = arith.constant 0 : index
      %c0_53 = arith.constant 0 : index
      %53 = vector.load %arg7[%c0_52, %c0_53] : memref<1x128xf32, #tpu.memory_space<vmem>>, vector<1x128xf32>
      %54 = vector.broadcast %53 : vector<1x128xf32> to vector<8x128xf32>
      %55 = arith.addf %52, %54 : vector<8x128xf32>
      %56 = vector.shape_cast %55 : vector<8x128xf32> to vector<1x8x128xf32>
      %57 = arith.truncf %56 : vector<1x8x128xf32> to vector<1x8x128xbf16>
      %c0_54 = arith.constant 0 : index
      %c0_55 = arith.constant 0 : index
      %c0_56 = arith.constant 0 : index
      %58 = vector.load %arg10[%c0_54, %c0_55, %c0_56] : memref<1x8x128xbf16, #tpu.memory_space<vmem>>, vector<1x8x128xbf16>
      tpu.vector_store %arg10[%c0_54, %c0_55, %c0_56], %57 {strides = array<i32>} : memref<1x8x128xbf16, #tpu.memory_space<vmem>>, vector<1x8x128xbf16>,
    } else {
    }
    %c0 = arith.constant 0 : index
    %c0_1 = arith.constant 0 : index
    %c0_2 = arith.constant 0 : index
    %3 = vector.load %arg4[%c0, %c0_1, %c0_2] : memref<1x8x32xbf16, #tpu.memory_space<vmem>>, vector<1x8x32xbf16>
    %4 = vector.shape_cast %3 : vector<1x8x32xbf16> to vector<8x32xbf16>
    %c0_3 = arith.constant 0 : index
    %c0_4 = arith.constant 0 : index
    %5 = vector.load %arg6[%c0_3, %c0_4] : memref<32x256xbf16, #tpu.memory_space<vmem>>, vector<32x256xbf16>
    %cst = arith.constant dense<0.000000e+00> : vector<8x256xf32>
    %6 = tpu.matmul %4, %5, %cst {dimension_numbers = #tpu.dot_dimension_numbers<[1], [0], [0], [1], [0, 0, 1, 1], [], []>} : vector<8x32xbf16>, vector<32x256xbf16>, vector<8x256xf32> -> vector<8x256xf32>
    %c0_5 = arith.constant 0 : index
    %c0_6 = arith.constant 0 : index
    %7 = vector.load %arg8[%c0_5, %c0_6] : memref<1x256xf32, #tpu.memory_space<vmem>>, vector<1x256xf32>
    %8 = vector.broadcast %7 : vector<1x256xf32> to vector<8x256xf32>
    %9 = arith.addf %6, %8 : vector<8x256xf32>
    %10 = vector.shape_cast %9 : vector<8x256xf32> to vector<1x8x256xf32>
    %11 = vector.extract_strided_slice %10 {offsets = [0, 0, 0], sizes = [1, 8, 128], strides = [1, 1, 1]} : vector<1x8x256xf32> to vector<1x8x128xf32>
    %12 = arith.truncf %11 : vector<1x8x128xf32> to vector<1x8x128xbf16>
    %13 = vector.extract_strided_slice %10 {offsets = [0, 0, 128], sizes = [1, 8, 128], strides = [1, 1, 1]} : vector<1x8x256xf32> to vector<1x8x128xf32>
    %14 = arith.truncf %13 : vector<1x8x128xf32> to vector<1x8x128xbf16>
    %c0_7 = arith.constant 0 : index
    %c0_8 = arith.constant 0 : index
    %c0_9 = arith.constant 0 : index
    %15 = vector.load %arg10[%c0_7, %c0_8, %c0_9] : memref<1x8x128xbf16, #tpu.memory_space<vmem>>, vector<1x8x128xbf16>
    "tpu.trace_start"() <{level = 10 : i32, message = "bqd,bkd->bqk"}> : () -> ()
    %cst_10 = arith.constant dense<0.000000e+00> : vector<1x8x8xf32>
    %16 = tpu.matmul %15, %12, %cst_10 {dimension_numbers = #tpu.dot_dimension_numbers<[2], [2], [1], [1], [0, 0, 0, 1, 1, 1], [0], [0]>} : vector<1x8x128xbf16>, vector<1x8x128xbf16>, vector<1x8x8xf32> -> vector<1x8x8xf32>
    "tpu.trace_stop"() : () -> ()
    %c0_11 = arith.constant 0 : index
    %c0_12 = arith.constant 0 : index
    %c0_13 = arith.constant 0 : index
    %17 = vector.load %arg11[%c0_11, %c0_12, %c0_13] : memref<1x8x1xf32, #tpu.memory_space<vmem>>, vector<1x8x1xf32>
    %cst_14 = arith.constant dense<0xFF800000> : vector<1x8xf32>
    %18 = vector.multi_reduction <maximumf>, %16, %cst_14 [2] : vector<1x8x8xf32> to vector<1x8xf32>
    %19 = vector.shape_cast %18 : vector<1x8xf32> to vector<1x8x1xf32>
    %20 = arith.maximumf %17, %19 : vector<1x8x1xf32>
    %21 = arith.subf %17, %20 : vector<1x8x1xf32>
    %22 = math.exp %21 : vector<1x8x1xf32>
    %23 = vector.broadcast %20 : vector<1x8x1xf32> to vector<1x8x8xf32>
    %24 = arith.subf %16, %23 : vector<1x8x8xf32>
    %25 = math.exp %24 : vector<1x8x8xf32>
    %c0_15 = arith.constant 0 : index
    %c0_16 = arith.constant 0 : index
    %c0_17 = arith.constant 0 : index
    %26 = vector.load %arg12[%c0_15, %c0_16, %c0_17] : memref<1x8x1xf32, #tpu.memory_space<vmem>>, vector<1x8x1xf32>
    %27 = arith.mulf %22, %26 : vector<1x8x1xf32>
    %cst_18 = arith.constant dense<0.000000e+00> : vector<1x8xf32>
    %28 = vector.multi_reduction <add>, %25, %cst_18 [2] : vector<1x8x8xf32> to vector<1x8xf32>
    %29 = vector.shape_cast %28 : vector<1x8xf32> to vector<1x8x1xf32>
    %30 = arith.addf %27, %29 : vector<1x8x1xf32>
    %c0_19 = arith.constant 0 : index
    %c0_20 = arith.constant 0 : index
    %c0_21 = arith.constant 0 : index
    %31 = vector.load %arg12[%c0_19, %c0_20, %c0_21] : memref<1x8x1xf32, #tpu.memory_space<vmem>>, vector<1x8x1xf32>
    tpu.vector_store %arg12[%c0_19, %c0_20, %c0_21], %30 {strides = array<i32>} : memref<1x8x1xf32, #tpu.memory_space<vmem>>, vector<1x8x1xf32>,
    %c0_22 = arith.constant 0 : index
    %c0_23 = arith.constant 0 : index
    %c0_24 = arith.constant 0 : index
    %32 = vector.load %arg13[%c0_22, %c0_23, %c0_24] : memref<1x8x128xf32, #tpu.memory_space<vmem>>, vector<1x8x128xf32>
    %33 = vector.broadcast %22 : vector<1x8x1xf32> to vector<1x8x128xf32>
    %34 = arith.mulf %33, %32 : vector<1x8x128xf32>
    %35 = arith.truncf %25 : vector<1x8x8xf32> to vector<1x8x8xbf16>
    "tpu.trace_start"() <{level = 10 : i32, message = "bqk,bkd->bqd"}> : () -> ()
    %cst_25 = arith.constant dense<0.000000e+00> : vector<1x8x128xf32>
    %36 = tpu.matmul %35, %14, %cst_25 {dimension_numbers = #tpu.dot_dimension_numbers<[2], [1], [1], [2], [0, 0, 0, 1, 1, 2], [0], [0]>} : vector<1x8x8xbf16>, vector<1x8x128xbf16>, vector<1x8x128xf32> -> vector<1x8x128xf32>
    "tpu.trace_stop"() : () -> ()
    %37 = arith.addf %34, %36 : vector<1x8x128xf32>
    %c0_26 = arith.constant 0 : index
    %c0_27 = arith.constant 0 : index
    %c0_28 = arith.constant 0 : index
    %38 = vector.load %arg13[%c0_26, %c0_27, %c0_28] : memref<1x8x128xf32, #tpu.memory_space<vmem>>, vector<1x8x128xf32>
    tpu.vector_store %arg13[%c0_26, %c0_27, %c0_28], %37 {strides = array<i32>} : memref<1x8x128xf32, #tpu.memory_space<vmem>>, vector<1x8x128xf32>,
    %c0_29 = arith.constant 0 : index
    %c0_30 = arith.constant 0 : index
    %c0_31 = arith.constant 0 : index
    %39 = vector.load %arg11[%c0_29, %c0_30, %c0_31] : memref<1x8x1xf32, #tpu.memory_space<vmem>>, vector<1x8x1xf32>
    tpu.vector_store %arg11[%c0_29, %c0_30, %c0_31], %20 {strides = array<i32>} : memref<1x8x1xf32, #tpu.memory_space<vmem>>, vector<1x8x1xf32>,
    %c0_i32_32 = arith.constant 0 : i32
    %40 = arith.cmpi eq, %arg2, %c0_i32_32 : i32
    %41 = arith.extui %40 : i1 to i32
    %c0_i32_33 = arith.constant 0 : i32
    %42 = arith.cmpi ne, %41, %c0_i32_33 : i32
    scf.if %42 {
      %c0_34 = arith.constant 0 : index
      %c0_35 = arith.constant 0 : index
      %c0_36 = arith.constant 0 : index
      %43 = vector.load %arg12[%c0_34, %c0_35, %c0_36] : memref<1x8x1xf32, #tpu.memory_space<vmem>>, vector<1x8x1xf32>
      %44 = tpu.reciprocal %43 {approx = true} : vector<1x8x1xf32> -> vector<1x8x1xf32>
      %c0_37 = arith.constant 0 : index
      %c0_38 = arith.constant 0 : index
      %c0_39 = arith.constant 0 : index
      %45 = vector.load %arg13[%c0_37, %c0_38, %c0_39] : memref<1x8x128xf32, #tpu.memory_space<vmem>>, vector<1x8x128xf32>
      %46 = vector.broadcast %44 : vector<1x8x1xf32> to vector<1x8x128xf32>
      %47 = arith.mulf %45, %46 : vector<1x8x128xf32>
      %c0_40 = arith.constant 0 : index
      %c0_41 = arith.constant 0 : index
      %c0_42 = arith.constant 0 : index
      %48 = vector.load %arg9[%c0_40, %c0_41, %c0_42] : memref<1x8x128xf32, #tpu.memory_space<vmem>>, vector<1x8x128xf32>
      tpu.vector_store %arg9[%c0_40, %c0_41, %c0_42], %47 {strides = array<i32>} : memref<1x8x128xf32, #tpu.memory_space<vmem>>, vector<1x8x128xf32>,
    } else {
    }
    return
  }
  func.func @transform_0(%arg0: i32, %arg1: i32, %arg2: i32) -> (i32, i32, i32) {
    %c0_i32 = arith.constant 0 : i32
    %c0_i32_0 = arith.constant 0 : i32
    return %arg0, %arg1, %c0_i32 : i32, i32, i32
  }
  func.func @transform_1(%arg0: i32, %arg1: i32, %arg2: i32) -> (i32, i32, i32) {
    %c0_i32 = arith.constant 0 : i32
    %c0_i32_0 = arith.constant 0 : i32
    return %arg0, %arg2, %c0_i32 : i32, i32, i32
  }
  func.func @transform_2(%arg0: i32, %arg1: i32, %arg2: i32) -> (i32, i32) {
    %c0_i32 = arith.constant 0 : i32
    %c0_i32_0 = arith.constant 0 : i32
    %c0_i32_1 = arith.constant 0 : i32
    return %c0_i32, %c0_i32_0 : i32, i32
  }
  func.func @transform_3(%arg0: i32, %arg1: i32, %arg2: i32) -> (i32, i32) {
    %c0_i32 = arith.constant 0 : i32
    %c0_i32_0 = arith.constant 0 : i32
    %c0_i32_1 = arith.constant 0 : i32
    return %c0_i32, %c0_i32_0 : i32, i32
  }
  func.func @transform_4(%arg0: i32, %arg1: i32, %arg2: i32) -> (i32, i32) {
    %c0_i32 = arith.constant 0 : i32
    %c0_i32_0 = arith.constant 0 : i32
    %c0_i32_1 = arith.constant 0 : i32
    return %c0_i32, %c0_i32_0 : i32, i32
  }
  func.func @transform_5(%arg0: i32, %arg1: i32, %arg2: i32) -> (i32, i32) {
    %c0_i32 = arith.constant 0 : i32
    %c0_i32_0 = arith.constant 0 : i32
    %c0_i32_1 = arith.constant 0 : i32
    return %c0_i32, %c0_i32_0 : i32, i32
  }
  func.func @transform_6(%arg0: i32, %arg1: i32, %arg2: i32) -> (i32, i32, i32) {
    %c0_i32 = arith.constant 0 : i32
    %c0_i32_0 = arith.constant 0 : i32
    return %arg0, %arg1, %c0_i32 : i32, i32, i32
  }
}

</mosaic_0001>

<bundles_post_ra>
// kernel: tpu_custom_call.1
= control target key start
LH: loop header
LB: loop body
LE: loop exit
PB: predicated region body
PF: predicated region fallthrough
CT: control target
= control target key end

     0   :  { %s1437_s0 = inlined_call_operand.hbm [shape: bf16[2,8,32], index: 0, kind: input, shape index: {}]   ;;  %s1438_s1 = inlined_call_operand.hbm [shape: bf16[2,8,32], index: 1, kind: input, shape index: {}]   ;;  %s1439_s2 = inlined_call_operand.hbm [shape: bf16[32,128], index: 2, kind: input, shape index: {}]   ;;  %s1440_s3 = inlined_call_operand.hbm [shape: bf16[32,256], index: 3, kind: input, shape index: {}]   ;;  %s1441_s4 = inlined_call_operand.vmem [shape: f32[1,128], index: 4, kind: input, shape index: {}]   ;;  %s1442_s5 = inlined_call_operand.vmem [shape: f32[1,256], index: 5, kind: input, shape index: {}]   ;;  %s1443_s6 = inlined_call_operand.hbm [shape: f32[2,8,128], index: 6, kind: output, shape index: {}]  }
   0x1   :  { %1445 = sst [smem:[#allocation20_spill]] %s1437_s0 }
   0x2   :  { %1446 = sst [smem:[#allocation21_spill]] %s1438_s1 }
   0x3   :  { %1447 = sst [smem:[#allocation22_spill]] %s1439_s2 }
   0x4   :  { %1448 = sst [smem:[#allocation23_spill]] %s1440_s3 }
   0x5   :  { %11 = vsyncpa [#allocation7], 0 }
   0x6   :  { %13 = vsyncpa [#allocation7 + $0x1], 0 }
   0x7   :  { %14 = vsyncpa [#allocation10], 0 }
   0x8   :  { %16 = vsyncpa [#allocation10 + $0x1], 0 }
   0x9   :  { %17 = vsyncpa [#allocation13], 0 }
   0xa   :  { %18 = vsyncpa [#allocation8], 0 }
   0xb   :  { %20 = vsyncpa [#allocation8 + $0x1], 0  ;;  %s1220_s21 = smov 0   ;;  %s1222_s22 = smov 0  }
   0xc   :  { %s1224_s23 = smov 0   ;;  %s1226_s24 = smov 0  }
   0xd   :  { %s1228_s25 = smov 0   ;;  %s1230_s26 = smov 0  }
   0xe LB: > { %s1251_s27 = sadd.s32 4294967295, %s1170_s26   ;;  %s802_s28 = sadd.s32 4294967294, %s1170_s26   ;;  %s1170_s26 = sphi %s1230_s26, %s26_s26   ;;  %s1166_s25 = sphi %s1228_s25, %s1470_s25   ;;  %s1162_s24 = sphi %s1226_s24, %s1469_s24   ;;  %s1158_s23 = sphi %s1224_s23, %s1468_s23   ;;  %s1154_s22 = sphi %s1222_s22, %s1467_s22   ;;  %s1150_s21 = sphi %s1220_s21, %s1466_s21  }
   0xf   : > { %p67_p0 = scmp.ne.s32.totalorder %s1154_s22, %s1150_s21  ;;  %p1444_p1 = scmp.eq.s32.totalorder %s1251_s27, 0 }
  0x10   : > { %p211_p3 = scmp.eq.s32.totalorder %s802_s28, 1  ;;  %p803_p5 = scmp.ge.s32.totalorder %s1170_s26, 1 }
  0x11   : > { %p1260_p4 = por %p1444_p1, %p67_p0  ;;  %p218_p7 = scmp.lt.s32.totalorder %s1170_s26, 3 }
  0x12   : > { %p1265_p6 = por %p211_p3, %p67_p0  ;;  %s1172_s8 = smov [#allocation11]  }
  0x13   : > { %p1270_p8 = pnand %p803_p5, %p218_p7  ;;  %s230_s9 = sshll.u32 %s1172_s8, 4  ;;  %s231_s9 = int_to_ptr.vmem [resolvable:$true] %s230_s9 }
  0x14   : > { %s1450_s30 = scalar_select %p1265_p6, 1, 0 }
  0x15   : > { %p872_p9 = pneg %p1270_p8  ;;  %s1173_s11 = smov [#allocation12]  }
  0x16   : > { %s243_s12 = sshll.u32 %s1173_s11, 4  ;;  %s981_s13 = scalar_lea.vmem %s231_s9, 256  ;;  %s244_s12 = int_to_ptr.vmem [resolvable:$true] %s243_s12 }
  0x17   : > { %p1279_p11 = pnand %p872_p9, %p1444_p1  ;;  %p982_p13 = scmp.ne.s32.totalorder %s231_s9, %s981_s13 }
  0x18   : > { %p989_p5 = scmp.lt.s32.totalorder %s231_s9, %s231_s9  ;;  %p990_p7 = scmp.lt.s32.totalorder %s981_s13, %s981_s13 }
  0x19   : > { %p972_p12 = pneg %p1279_p11 }
  0x1a   : > { %p991_p10 = por %p990_p7, %p989_p5 }
  0x1b   : > { %p984_p0 = pnand %p982_p13, %p972_p12 }
  0x1d   : > { %p985_p3 = pneg %p984_p0 }
  0x1f   : > { %p992_p9 = pnand %p991_p10, %p985_p3 }
  0x21   : > { %995 = shalt.err (!%p992_p9)
}
  0x22   : > { %s1174_s14 = smov 64   ;;  %s1175_s15 = smov 4  }
  0x23   : > { %s1453_s2 = sld [smem:[#allocation22_spill]]  ;;  %s1007_s18 = scalar_lea.vmem %s244_s12, 512 }
  0x24   : > { %p1008_p1 = scmp.ne.s32.totalorder %s244_s12, %s1007_s18  ;;  %p1015_p2 = scmp.lt.s32.totalorder %s244_s12, %s244_s12 }
  0x25   : > { %p1016_p6 = scmp.lt.s32.totalorder %s1007_s18, %s1007_s18 }
  0x26   : > { %p1010_p13 = pnand %p1008_p1, %p972_p12 }
  0x27   : > { %p1017_p5 = por %p1016_p6, %p1015_p2 }
  0x28   : > { %p1011_p0 = pneg %p1010_p13 }
  0x29   : > { %875 = dma.hbm_to_vmem [thread:$0]  (!%p1279_p11), %s1453_s2, 256, %s231_s9, [#allocation10], %s1174_s14, %s1174_s14, %s1175_s15  }
  0x2a   : > { %p1018_p10 = pnand %p1017_p5, %p1011_p0 }
  0x2c   : > { %1021 = shalt.err (!%p1018_p10)
}
  0x2d   : > { %s1176_s19 = smov 128   ;;  %s1177_s20 = smov 8  }
  0x2e   : > { %s1454_s3 = sld [smem:[#allocation23_spill]]  ;;  %s45_s9 = sadd.s32 1, %s1166_s25 }
  0x2f   : > { %s54_s11 = sadd.s32 1, %s1158_s23  ;;  %p47_p1 = scmp.ge.s32.totalorder %s45_s9, 2 }
  0x30   : > { %p61_p2 = scmp.ne.s32.totalorder %s1158_s23, %s1154_s22  ;;  %p62_p6 = scmp.eq.s32.totalorder %s1170_s26, 0 }
  0x31   : > { %p892_p12 = scmp.lt.s32.totalorder %s1170_s26, 2  ;;  %s1472_s9 = smov (%p47_p1, %s45_s9), 0 }
  0x32   : > { %p63_p3 = por %p62_p6, %p61_p2  ;;  %p1455_p7 = scmp.eq.s32.totalorder %s1251_s27, 1 }
  0x33   : > { %s49_s10 = ssub.s32 %s1166_s25, %s1472_s9  ;;  %s263_s14 = sand.u32 1, %s1158_s23  }
  0x34   : > { %878 = dma.hbm_to_vmem [thread:$0]  (!%p1279_p11), %s1454_s3, 512, %s244_s12, [#allocation13], %s1176_s19, %s1176_s19, %s1177_s20  }
  0x35   : > { %p1311_p9 = por %p1455_p7, %p61_p2  ;;  %p52_p13 = scmp.eq.s32.totalorder %s49_s10, 0 }
  0x36   : > { %s807_s12 = sshll.u32 %s263_s14, 2  ;;  %s808_s15 = sshll.u32 %s1166_s25, 6 }
  0x37   : > { %s1320_s16 = scalar_select %p52_p13, %s1158_s23, %s54_s11  }
  0x38   : > { %s1457_s0 = sld [smem:[#allocation20_spill]]  ;;  %s267_s20 = scalar_lea.vmem [#allocation6], %s807_s12 }
  0x39   : > { %s275_s28 = sshll.u32 %s267_s20, 4  ;;  %p1327_p11 = pnand %p892_p12, %p63_p3  ;;  %s276_s28 = int_to_ptr.vmem [resolvable:$true] %s275_s28 }
  0x3a   : > { %s1459_s1 = sld [smem:[#allocation21_spill]]  ;;  %s264_s11 = scalar_lea.sflag [#allocation7], %s263_s14 }
  0x3b   : > { %p1024_p0 = pneg %p1327_p11  ;;  %s1035_s17 = scalar_lea.vmem %s276_s28, 64 }
  0x3c   : > { %p1036_p5 = scmp.ne.s32.totalorder %s276_s28, %s1035_s17  ;;  %s1178_s18 = smov [#allocation6]  }
  0x3d   : > { %s1040_s20 = sshll.u32 %s1178_s18, 4  ;;  %s1041_s20 = int_to_ptr.vmem [resolvable:$false] %s1040_s20 }
  0x3e   : > { %s273_s19 = scalar_lea.hbm %s1457_s0, %s808_s15  ;;  %p1038_p10 = pnand %p1036_p5, %p1024_p0 }
  0x3f   : > { %s1042_s0 = scalar_lea.vmem %s1041_s20, 128  ;;  %p1043_p2 = scmp.lt.s32.totalorder %s276_s28, %s1041_s20 }
  0x40   : > { %s1334_s3 = scalar_lea.hbm %s1459_s1, %s808_s15  ;;  %p1039_p1 = pneg %p1038_p10 }
  0x41   : > { %p1044_p6 = scmp.lt.s32.totalorder %s1042_s0, %s1035_s17 }
  0x43   : > { %p1045_p12 = por %p1044_p6, %p1043_p2 }
  0x45   : > { %p1046_p3 = pnand %p1045_p12, %p1039_p1 }
  0x47   : > { %1049 = shalt.err (!%p1046_p3)
}
  0x48   : > { %882 = dma.hbm_to_vmem [thread:$0]  (!%p1327_p11), %s273_s19, 64, %s276_s28, %s264_s11  }
  0x49   : > { %s282_s2 = sand.u32 1, %s1170_s26   ;;  %s286_s14 = scalar_lea.vmem [#allocation9], %s807_s12 }
  0x4a   : > { %s294_s15 = sshll.u32 %s286_s14, 4  ;;  %s283_s10 = scalar_lea.sflag [#allocation10], %s282_s2  ;;  %s295_s15 = int_to_ptr.vmem [resolvable:$true] %s294_s15 }
  0x4b   : > { %s1063_s1 = scalar_lea.vmem %s295_s15, 64  ;;  %s1179_s0 = smov [#allocation9]  }
  0x4c   : > { %p1064_p7 = scmp.ne.s32.totalorder %s295_s15, %s1063_s1  ;;  %s1068_s17 = sshll.u32 %s1179_s0, 4  ;;  %s1069_s17 = int_to_ptr.vmem [resolvable:$false] %s1068_s17 }
  0x4d   : > { %s1070_s18 = scalar_lea.vmem %s1069_s17, 128  ;;  %p1071_p10 = scmp.lt.s32.totalorder %s295_s15, %s1069_s17 }
  0x4e   : > { %p1066_p13 = pnand %p1064_p7, %p1024_p0  ;;  %p1072_p1 = scmp.lt.s32.totalorder %s1070_s18, %s1063_s1 }
  0x50   : > { %p1067_p5 = pneg %p1066_p13  ;;  %p1073_p2 = por %p1072_p1, %p1071_p10 }
  0x52   : > { %p1074_p6 = pnand %p1073_p2, %p1067_p5 }
  0x54   : > { %1077 = shalt.err (!%p1074_p6)
}
  0x55   : > { %885 = dma.hbm_to_vmem [thread:$0]  (!%p1327_p11), %s1334_s3, 64, %s295_s15, %s283_s10  }
  0x56   : > { %303 = sbr.rel (%p1270_p8) target bundleno = 1095 (0x447), region = 44  ;;  %s1353_s12 = sand.u32 (!%p1270_p8), 1, %s1154_s22  }
  0x57   : > { %s812_s19 = sshll.u32 (!%p1270_p8), %s1353_s12, 2  ;;  %s306_s28 = scalar_lea.sflag (!%p1270_p8), [#allocation7], %s1353_s12 }
  0x58   : > { %s1357_s11 = scalar_lea.vmem (!%p1270_p8), [#allocation6], %s812_s19 }
  0x5b   : > { %1129 = dma.done.wait (%p1260_p4), %s306_s28, 64  }
  0x5c   : > { %1131 = vsyncadd (%p1260_p4), %s306_s28, 4294967232  ;;  %s314_s1 = sand.u32 1, %s1251_s27   ;;  %s1364_s7 = scalar_lea.vmem [#allocation9], %s812_s19 }
  0x5d   : > { %s315_s3 = scalar_lea.sflag [#allocation10], %s314_s1 }
  0x5e   : > { %1133 = dma.done.wait (%p1260_p4), %s315_s3, 64  }
  0x5f   : > { %1135 = vsyncadd (%p1260_p4), %s315_s3, 4294967232  ;;  %p1460_p8 = scmp.eq.s32.totalorder %s1251_s27, 0 }
  0x61   : > { %1137 = dma.done.wait (%p1460_p8), [#allocation10], 256   ;;  %p1461_p11 = pmov %p1460_p8 }
  0x62   : > { %p1462_p0 = pmov %p1460_p8 }
  0x63   : > { %1139 = vsyncadd (%p1461_p11), [#allocation10], 4294967040 }
  0x64   : > { %1141 = dma.done.wait (%p1462_p0), [#allocation13], 512   ;;  %p1463_p12 = pmov %p1462_p0 }
  0x65   : > { %v1180_v0 = vmov 0.0   ;;  %vm1181_vm0 = vmmov 0   ;;  %v1182_v1 = vmov 0   ;;  %v956_v2 = vld [vmem:[#allocation11 + $0x8] sm:$0xff]   ;;  %v960_v5 = vld [vmem:[#allocation11] sm:$0xff]   ;;  %vm393_vm1 = vcmask 261120  }
  0x66   : > { %1143 = vsyncadd (%p1463_p12), [#allocation13], 4294966784  ;;  %838 = vmatprep.subr.bf16.mxu0 %v1180_v0  ;;  %842 = vmatprep.mubr.msk.bf16.mxu0 %vm1181_vm0, %v1180_v0  ;;  %v957_v3 = vld [vmem:[#allocation12 + $0x14] ss:$8 sps:$4 sm:$0xff]   ;;  %v959_v4 = vld [vmem:[#allocation12 + $0x10] ss:$8 sps:$4 sm:$0xff]   ;;  %v446_v10 = vlaneseq }
  0x67   : > { %512 = vmatprep.mubr.bf16.mxu1 %v1182_v1  ;;  %954 = vset.pattern.permute.xlu0 %v1182_v1  ;;  %v961_v6 = vld [vmem:[#allocation12 + $0x4] ss:$8 sps:$4 sm:$0xff]   ;;  %v963_v7 = vld [vmem:[#allocation12] ss:$8 sps:$4 sm:$0xff]   ;;  %vm600_vm2 = vcmask 1043456   ;;  %vm365_vm3 = vcmask 7168  }
  0x68   : > { %955 = vset.pattern.permute.xlu1 %v1182_v1  ;;  %839 = vmatpush3.bf16.msra.mxu0 %v956_v2  ;;  %v369_v8 = vld [vmem:[%s1357_s11] sm:$0xf]  ;;  %v439_v9 = vld [vmem:[%s1364_s7] sm:$0xf]  ;;  %v447_v11 = vshrl.u32 %v446_v10, 7  ;;  %v1183_v34 = vmov -inf  }
  0x69   : > { %492 = vmatprep.subr.bf16.mxu1 %v957_v3  ;;  %840 = vmatprep.subr.bf16.mxu0 %v1180_v0  ;;  %v444_v13 = vld [vmem:[%s1442_s5] sm:$0x3]  ;;  %366 = vst.msk [vmem:[#allocation3] sm:$0xff] %vm365_vm3, %v1183_v34  ;;  %367 = vst.msk [vmem:[#allocation4] sm:$0xff] %vm365_vm3, %v1180_v0  ;;  %vm565_vm4 = vcmask 64512   ;;  %s816_s2 = sshll.u32 %s1353_s12, 3 }
  0x6a   : > { %493 = vmatpush1.bf16.msra.mxu1 %v959_v4  ;;  %v448_v12 = vsub.s32 0, %v447_v11  ;;  %v452_v14 = vsub.s32 1, %v447_v11  ;;  %v817_v15 = vld [vmem:[%s1441_s4] ss:$0 sm:$0xff]  ;;  %s828_s14 = sshll.u32 %s1162_s24, 7  ;;  %s359_s15 = scalar_lea.vmem [#allocation14], %s816_s2 }
  0x6b   : > { %494 = vmatprep.subr.bf16.mxu1 %v961_v6  ;;  %s675_s10 = sshll.u32 %s359_s15, 4  ;;  %s673_s18 = scalar_lea.hbm %s1443_s6, %s828_s14  ;;  %s676_s10 = int_to_ptr.vmem [resolvable:$true] %s675_s10 }
  0x6c   : > { %841 = vmatpush3.bf16.msra.mxu0 %v960_v5  ;;  %v449_v16 = vrot.slane %v444_v13, %v448_v12  ;;  %v453_v19 = vrot.slane %v444_v13, %v452_v14  ;;  %s661_s19 = scalar_lea.sflag [#allocation8], %s1353_s12  ;;  %s1078_s28 = scalar_lea.vmem %s676_s10, 128 }
  0x6d   : > { %846 = vmatprep.subr.bf16.mxu0 %v1180_v0  ;;  %p1079_p4 = scmp.ne.s32.totalorder %s676_s10, %s1078_s28  ;;  %s1184_s11 = smov [#allocation14]  }
  0x6e   : > { %495 = vmatpush1.bf16.msra.mxu1 %v963_v7  ;;  %s1082_s1 = sshll.u32 %s1184_s11, 4  ;;  %s1083_s1 = int_to_ptr.vmem [resolvable:$false] %s1082_s1 }
  0x6f   : > { %843 = vmatmul.mubr.msk.bf16.vlgmr.msra.gmra.mxu0 %vm393_vm1, %v369_v8  ;;  %852 = vmatprep.subr.bf16.mxu1 %v1180_v0  ;;  %p1080_p3 = pnand %p1079_p4, %p1311_p9  ;;  %s1084_s24 = scalar_lea.vmem %s1083_s1, 256 }
  0x70   : > { %848 = vmatprep.mubr.msk.bf16.mxu0 %vm1181_vm0, %v1180_v0  ;;  %v564_v40 = vld [vmem:[#allocation3] sm:$0xff]  ;;  %v581_v52 = vld [vmem:[#allocation4] sm:$0xff]  ;;  %p1085_p13 = scmp.lt.s32.totalorder %s676_s10, %s1083_s1  ;;  %p1086_p5 = scmp.lt.s32.totalorder %s1084_s24, %s1078_s28 }
  0x71   : > { %825 = vmatmul.mubr.msk.bf16.vlgmr.msra.gmra.mxu1 %vm393_vm1, %v439_v9  ;;  %p1081_p7 = pneg %p1080_p3 }
  0x72   : > { %854 = vmatprep.mubr.msk.bf16.mxu1 %vm1181_vm0, %v1180_v0  ;;  %p1087_p10 = por %p1086_p5, %p1085_p13 }
  0x74   : > { %p1088_p1 = pnand %p1087_p10, %p1081_p7 }
 0x12f   : > { %v431_v17 = vpop.f32.mrf.mxu0 }
 0x130   : > { %v432_v18 = vadd.f32 %v817_v15, %v431_v17 }
 0x131   : > { %v514_v20 = vpop.f32.mrf.mxu1  ;;  %v844_v21 = vpop.f32.mrf.mxu0 }
 0x132   : > { %v437_v22 = vpack.c.bf16 %v432_v18, %v432_v18  ;;  %v515_v23 = vadd.f32 %v514_v20, %v449_v16 }
 0x133   : > { %v516_v24 = vpop.f32.mrf.mxu1  ;;  %v434_v25 = vpop.f32.mrf.mxu0 }
 0x134   : > { %438 = vst [vmem:[#allocation2] sm:$0xf] %v437_v22  ;;  %v521_v26 = vpack.c.bf16 %v515_v23, %v515_v23  ;;  %v517_v27 = vadd.f32 %v516_v24, %v453_v19 }
 0x135   : > { %v518_v28 = vpop.f32.mrf.mxu1  ;;  %v845_v29 = vpop.f32.mrf.mxu0 }
 0x136   : > { %v522_v30 = vpack.c.bf16 %v517_v27, %v517_v27  ;;  %847 = vmatpush3.bf16.xpose.msra.mxu0 %v521_v26 }
 0x137   : > { %v519_v31 = vpop.f32.mrf.mxu1 }
 0x138   : > { %v602_v32 = vsel %vm600_vm2, %v522_v30, 0 }
 0x139   : > { %853 = vmatpush3.bf16.msra.mxu1 %v602_v32 }
 0x13b   : > { %v523_v33 = vld [vmem:[#allocation2] sm:$0xf] }
 0x13d   : > { %849 = vmatmul.mubr.bf16.vlgmr.msra.gmra.mxu0 %v523_v33 }
 0x1fd   : > { %v558_v35 = vpop.f32.mrf.mxu0 }
 0x1fe   : > { %v566_v36 = vsel %vm565_vm4, %v558_v35, -inf }
 0x1ff   : > { %567 = vmax.xlane.f32.xlu0 %v566_v36  ;;  %v850_v37 = vpop.f32.mrf.mxu0 }
 0x201   : > { %v561_v38 = vpop.f32.mrf.mxu0 }
 0x203   : > { %v851_v39 = vpop.f32.mrf.mxu0 }
 0x288   : > { %v568_v41 = vpop.xlane.xlu0 %567 }
 0x289   : > { %v569_v42 = vmax.f32 %v564_v40, %v568_v41 }
 0x28b   : > { %v570_v43 = vsub.f32 %v564_v40, %v569_v42  ;;  %646 = vst.msk [vmem:[#allocation3] sm:$0xff] %vm365_vm3, %v569_v42  ;;  %575 = vperm.xlu0 %954, %v569_v42  }
 0x28d   : > { %v571_v48 = vmul.f32 1.442695, %v570_v43 }
 0x306   : > { %v576_v44 = vpop.permute.xlu0 %575 }
 0x307   : > { %v578_v45 = vsub.f32 %v558_v35, %v576_v44 }
 0x309   : > { %v579_v46 = vmul.f32 1.442695, %v578_v45 }
 0x30b   : > { %964 = vpow2.f32 %v579_v46 }
 0x30c   : > { %966 = vpow2.f32 %v571_v48 }
 0x318   : > { %v965_v47 = vpop.eup %964 }
 0x319   : > { %v583_v49 = vsel %vm565_vm4, %v965_v47, 0.0  ;;  %v596_v50 = vpack.c.bf16 %v965_v47, %v965_v47  ;;  %v967_v51 = vpop.eup %966 }
 0x31a   : > { %584 = vadd.xlane.f32.xlu1 %v583_v49  ;;  %v582_v53 = vmul.f32 %v967_v51, %v581_v52 }
 0x31b   : > { %855 = vmatmul.mubr.msk.bf16.vlgmr.msra.gmra.mxu1 %vm565_vm4, %v596_v50 }
 0x32b   : > { %592 = vperm.xlu1 %955, %v967_v51  }
 0x3a3   : > { %v585_v54 = vpop.xlane.xlu1 %584 }
 0x3a4   : > { %v586_v55 = vadd.f32 %v585_v54, %v582_v53 }
 0x3a6   : > { %588 = vst.msk [vmem:[#allocation4] sm:$0xff] %vm365_vm3, %v586_v55 }
 0x3a7   : > { %v593_v62 = vpop.permute.xlu1 %592 }
 0x3a8   : > { %v595_v63 = vmul.f32 0.0, %v593_v62 }
 0x3ad   : > { %v650_v56 = vld [vmem:[#allocation4] sm:$0xff] }
 0x3ae   : > { %968 = vrcp.f32 %v650_v56 }
 0x3bb   : > { %v969_v57 = vpop.eup %968 }
 0x3bc   : > { %655 = vperm.xlu1 %955, %v969_v57  }
 0x3db   : > { %v638_v58 = vpop.f32.mrf.mxu1 }
 0x3dc   : > { %v644_v0 = vadd.f32 %v638_v58, %v595_v63 }
 0x3dd   : > { %v856_v59 = vpop.f32.mrf.mxu1 }
 0x3df   : > { %v641_v60 = vpop.f32.mrf.mxu1 }
 0x3e1   : > { %v857_v61 = vpop.f32.mrf.mxu1 }
 0x437   : > { %v656_v1 = vpop.permute.xlu1 %655 }
 0x438   : > { %v658_v2 = vmul.f32 %v656_v1, %v644_v0 }
 0x43a   : > { %659 = vst [vmem:[%s359_s15] sm:$0xff] %v658_v2 }
 0x43b   : > { %1091 = shalt.err (!%p1088_p1)
}
 0x43c   : > { %s1092_s3 = scalar_lea.hbm %s673_s18, 128  ;;  %s1096_s27 = scalar_lea.hbm %s1443_s6, 256 }
 0x43d   : > { %p1093_p2 = scmp.ne.s32.totalorder %s673_s18, %s1092_s3  ;;  %p1097_p11 = scmp.lt.s32.totalorder %s673_s18, %s1443_s6 }
 0x43e   : > { %p1098_p0 = scmp.lt.s32.totalorder %s1096_s27, %s1092_s3 }
 0x43f   : > { %p1094_p6 = pnand %p1093_p2, %p1311_p9 }
 0x440   : > { %p1099_p12 = por %p1098_p0, %p1097_p11 }
 0x441   : > { %p1095_p8 = pneg %p1094_p6 }
 0x443   : > { %p1100_p4 = pnand %p1099_p12, %p1095_p8 }
 0x445   : > { %1103 = shalt.err (!%p1100_p4)
}
 0x446   : > { %870 = dma.vmem_to_hbm [thread:$0]  (%p1311_p9), %s676_s10, 128, %s673_s18, %s661_s19  }
 0x447 PF: > { %s687_s20 = sand.u32 1, %s1150_s21   ;;  %p1464_p3 = scmp.ne.s32.totalorder %s1450_s30, 0 }
 0x448   : > { %p1465_p7 = scmp.ge.s32.totalorder %s1170_s26, 2  ;;  %s688_s2 = scalar_lea.sflag [#allocation8], %s687_s20 }
 0x44a   : > { %p887_p13 = pnand %p1465_p7, %p1464_p3 }
 0x44c   : > { %p888_p5 = pneg %p887_p13 }
 0x44e   : > { %1145 = dma.done.wait (%p888_p5), %s688_s2, 128  }
 0x44f   : > { %1147 = vsyncadd (%p888_p5), %s688_s2, 4294967168  ;;  %s26_s26 = sadd.s32 1, %s1170_s26   ;;  %s1466_s21 = smov %s1154_s22 }
 0x450   : > { %p23_p10 = scmp.ge.s32.totalorder %s26_s26, 4   ;;  %s1467_s22 = smov %s1158_s23 }
 0x451   : > { %s1468_s23 = smov %s1320_s16  ;;  %s1469_s24 = smov %s1166_s25 }
 0x452   : > { %s1470_s25 = smov %s1472_s9  ;;  %25 = sbr.rel (!%p23_p10) target bundleno = 14 (0xe), region = 118 }
 0x457   :  { %693 = vsyncpa [#allocation7], 1 }
 0x458   :  { %695 = vsyncpa [#allocation7 + $0x1], 1 }
 0x459   :  { %696 = vsyncpa [#allocation10], 1 }
 0x45a   :  { %698 = vsyncpa [#allocation10 + $0x1], 1 }
 0x45b   :  { %699 = vsyncpa [#allocation13], 1 }
 0x45c   :  { %700 = vsyncpa [#allocation8], 1 }
 0x45d   :  { %702 = vsyncpa [#allocation8 + $0x1], 1 }

</bundles_post_ra>
